<compile_context>
chip_gen: v5e
topology: v5e:2x2
jax: 0.10.0
libtpu: 0.0.40
codegen_flags: <defaults>
</compile_context>

<pallas_src>
import jax
import jax.numpy as jnp
from jax.experimental import pallas as pl
from jax.experimental.pallas import tpu as pltpu

LANE = 128      # vreg lane width / MXU column dim
SUBLANE = 8     # f32 sublane count


def _round_up(x, m):
    return ((x + m - 1) // m) * m


def qnetwork_kernel(x_ref, w1_ref, b1_ref, w2_ref, b2_ref, w3_ref, b3_ref,
                    o_ref):
    """Fused 3-layer MLP for one batch tile (f32 MXU, f32 VPU)."""
    # fc1 + ReLU
    h1 = jnp.dot(x_ref[...], w1_ref[...], preferred_element_type=jnp.float32)
    h1 = jnp.maximum(h1 + b1_ref[...], 0.0)
    # fc2 + ReLU
    h2 = jnp.dot(h1, w2_ref[...], preferred_element_type=jnp.float32)
    h2 = jnp.maximum(h2 + b2_ref[...], 0.0)
    # fc3 (no activation)
    out = jnp.dot(h2, w3_ref[...], preferred_element_type=jnp.float32)
    o_ref[...] = (out + b3_ref[...]).astype(o_ref.dtype)


def prepare_qnetwork_params(w1, b1, w2, b2, w3, b3):
    """One-time preprocessing (call at init, NOT per forward).

    Zero-pads the hidden dim to a full 128-lane width. Padded lanes stay
    exactly zero through bias-add and ReLU, and the padded rows of w2/w3
    contribute zero, so the math is unchanged.
    """
    hidden = w1.shape[1]
    hp = _round_up(hidden, LANE)
    if hp != hidden:
        dh = hp - hidden
        w1 = jnp.pad(w1, ((0, 0), (0, dh)))
        b1 = jnp.pad(b1, ((0, 0), (0, dh)))
        w2 = jnp.pad(w2, ((0, dh), (0, dh)))
        b2 = jnp.pad(b2, ((0, 0), (0, dh)))
        w3 = jnp.pad(w3, ((0, dh), (0, 0)))
    return w1, b1, w2, b2, w3, b3


def _choose_batch_tile(batch):
    """Batch tile: big enough to amortize per-step overhead, >=2 grid steps
    for large batch (so v7x's two TensorCores both get work), capped at 1024
    rows, and always a multiple of the f32 sublane count."""
    if batch <= 2 * SUBLANE:
        return SUBLANE
    tb = _round_up(pl.cdiv(batch, 2), SUBLANE)
    return min(tb, 1024)


def qnetwork_forward(x, w1, b1, w2, b2, w3, b3):
    """relu(x@w1+b1) -> relu(.@w2+b2) -> .@w3+b3 (params from prepare_*)."""
    batch, in_features = x.shape
    hp = w1.shape[1]
    out_features = w3.shape[1]

    # Tiny-batch safety: keep at least one full sublane of rows.
    if batch < SUBLANE:
        x = jnp.pad(x, ((0, SUBLANE - batch), (0, 0)))
    padded_batch = max(batch, SUBLANE)

    tb = _choose_batch_tile(padded_batch)
    grid = (pl.cdiv(padded_batch, tb),)   # no x padding; partial block masked

    flops = 2 * padded_batch * (in_features * hp + hp * hp + hp * out_features)
    bytes_accessed = 4 * (padded_batch * in_features
                          + in_features * hp + hp * hp + hp * out_features
                          + 2 * hp + out_features
                          + padded_batch * out_features)

    # VMEM budget: double-buffered x/out tiles + single-buffered resident
    # weights/biases + (tb, hp) f32 intermediates; 2x headroom, 4 MiB floor,
    # capped under v7x's 64 MiB physical / v5e's 128 MiB physical VMEM.
    vmem_need = (2 * tb * in_features * 4          # x tile, double-buffered
                 + 2 * tb * out_features * 4       # out tile, double-buffered
                 + (in_features * hp + hp * hp + hp * out_features) * 4
                 + (2 * hp + out_features) * 4
                 + 2 * tb * hp * 4)                # h1/h2 f32 intermediates
    vmem_limit = min(max(2 * vmem_need, 4 * 1024 * 1024), 32 * 1024 * 1024)

    resident = dict(pipeline_mode=pl.Buffered(buffer_count=1))

    out = pl.pallas_call(
        qnetwork_kernel,
        out_shape=jax.ShapeDtypeStruct((padded_batch, out_features),
                                       jnp.float32),
        grid=grid,
        in_specs=[
            pl.BlockSpec((tb, in_features), lambda i: (i, 0)),              # x
            pl.BlockSpec((in_features, hp), lambda i: (0, 0), **resident),  # w1
            pl.BlockSpec((1, hp), lambda i: (0, 0), **resident),            # b1
            pl.BlockSpec((hp, hp), lambda i: (0, 0), **resident),           # w2
            pl.BlockSpec((1, hp), lambda i: (0, 0), **resident),            # b2
            pl.BlockSpec((hp, out_features), lambda i: (0, 0), **resident), # w3
            pl.BlockSpec((1, out_features), lambda i: (0, 0), **resident),  # b3
        ],
        out_specs=pl.BlockSpec((tb, out_features), lambda i: (i, 0)),
        compiler_params=pltpu.CompilerParams(
            dimension_semantics=("parallel",),
            vmem_limit_bytes=vmem_limit),
        cost_estimate=pl.CostEstimate(
            flops=flops, transcendentals=0, bytes_accessed=bytes_accessed),
    )(x, w1, b1, w2, b2, w3, b3)

    return out[:batch]


qnetwork_forward_jit = jax.jit(qnetwork_forward)


def init_linear_params(key, in_features, out_features):
    """PyTorch-style init: U(-1/sqrt(fan_in), 1/sqrt(fan_in))."""
    kw, kb = jax.random.split(key)
    bound = 1.0 / jnp.sqrt(jnp.float32(in_features))
    w = jax.random.uniform(kw, (in_features, out_features), jnp.float32,
                           minval=-bound, maxval=bound)
    b = jax.random.uniform(kb, (1, out_features), jnp.float32,
                           minval=-bound, maxval=bound)
    return w, b


if __name__ == "__main__":
    batch = 8
    input_size = 16
    hidden_size = 64
    output_size = 4

    key = jax.random.PRNGKey(0)
    kx, k1, k2, k3 = jax.random.split(key, 4)

    x = jax.random.normal(kx, (batch, input_size), jnp.float32)
    w1, b1 = init_linear_params(k1, input_size, hidden_size)
    w2, b2 = init_linear_params(k2, hidden_size, hidden_size)
    w3, b3 = init_linear_params(k3, hidden_size, output_size)

    # One-time preprocessing (hidden-dim pad to 128); the hot-path forward
    # takes the prepared params directly.
    params = prepare_qnetwork_params(w1, b1, w2, b2, w3, b3)
    params = jax.block_until_ready(params)

    out = qnetwork_forward_jit(x, *params)
    out = jax.block_until_ready(out)
    assert out.shape == (batch, output_size)

    # Full-f32 reference (exact PyTorch Linear/ReLU semantics).
    rf = jnp.maximum(x @ w1 + b1, 0.0)
    rf = jnp.maximum(rf @ w2 + b2, 0.0)
    ref_f32 = rf @ w3 + b3
    assert jnp.allclose(out, ref_f32, atol=1e-3, rtol=1e-3), (
        jnp.max(jnp.abs(out - ref_f32)))

    print("KERNEL_OK")
</pallas_src>

<mosaic_0001>
module attributes {stable_mosaic.version = 11 : i64} {
  func.func @qnetwork_kernel(%arg0: i32, %arg1: memref<8x16xf32, #tpu.memory_space<vmem>>, %arg2: memref<16x128xf32, #tpu.memory_space<vmem>>, %arg3: memref<1x128xf32, #tpu.memory_space<vmem>>, %arg4: memref<128x128xf32, #tpu.memory_space<vmem>>, %arg5: memref<1x128xf32, #tpu.memory_space<vmem>>, %arg6: memref<128x4xf32, #tpu.memory_space<vmem>>, %arg7: memref<1x4xf32, #tpu.memory_space<vmem>>, %arg8: memref<8x4xf32, #tpu.memory_space<vmem>>) attributes {dimension_semantics = [#tpu.dimension_semantics<parallel>], iteration_bounds = array<i64: 1>, scalar_prefetch = 0 : i64, scratch_operands = 0 : i64, tpu.core_type = #tpu.core_type<tc>, window_params = [{transform_indices = @transform_0, window_bounds = array<i64: 8, 16>}, {pipeline_mode = #tpu.pipeline_mode<synchronous>, transform_indices = @transform_1, window_bounds = array<i64: 16, 128>}, {pipeline_mode = #tpu.pipeline_mode<synchronous>, transform_indices = @transform_2, window_bounds = array<i64: 1, 128>}, {pipeline_mode = #tpu.pipeline_mode<synchronous>, transform_indices = @transform_3, window_bounds = array<i64: 128, 128>}, {pipeline_mode = #tpu.pipeline_mode<synchronous>, transform_indices = @transform_4, window_bounds = array<i64: 1, 128>}, {pipeline_mode = #tpu.pipeline_mode<synchronous>, transform_indices = @transform_5, window_bounds = array<i64: 128, 4>}, {pipeline_mode = #tpu.pipeline_mode<synchronous>, transform_indices = @transform_6, window_bounds = array<i64: 1, 4>}, {transform_indices = @transform_7, window_bounds = array<i64: 8, 4>}]} {
    %c0 = arith.constant 0 : index
    %c0_0 = arith.constant 0 : index
    %0 = vector.load %arg1[%c0, %c0_0] : memref<8x16xf32, #tpu.memory_space<vmem>>, vector<8x16xf32>
    %c0_1 = arith.constant 0 : index
    %c0_2 = arith.constant 0 : index
    %1 = vector.load %arg2[%c0_1, %c0_2] : memref<16x128xf32, #tpu.memory_space<vmem>>, vector<16x128xf32>
    %cst = arith.constant dense<0.000000e+00> : vector<8x128xf32>
    %2 = tpu.matmul %0, %1, %cst {dimension_numbers = #tpu.dot_dimension_numbers<[1], [0], [0], [1], [0, 0, 1, 1], [], []>} : vector<8x16xf32>, vector<16x128xf32>, vector<8x128xf32> -> vector<8x128xf32>
    %c0_3 = arith.constant 0 : index
    %c0_4 = arith.constant 0 : index
    %3 = vector.load %arg3[%c0_3, %c0_4] : memref<1x128xf32, #tpu.memory_space<vmem>>, vector<1x128xf32>
    %4 = vector.broadcast %3 : vector<1x128xf32> to vector<8x128xf32>
    %5 = arith.addf %2, %4 : vector<8x128xf32>
    %cst_5 = arith.constant 0.000000e+00 : f32
    %6 = vector.broadcast %cst_5 : f32 to vector<8x128xf32>
    %7 = arith.maximumf %5, %6 : vector<8x128xf32>
    %c0_6 = arith.constant 0 : index
    %c0_7 = arith.constant 0 : index
    %8 = vector.load %arg4[%c0_6, %c0_7] : memref<128x128xf32, #tpu.memory_space<vmem>>, vector<128x128xf32>
    %cst_8 = arith.constant dense<0.000000e+00> : vector<8x128xf32>
    %9 = tpu.matmul %7, %8, %cst_8 {dimension_numbers = #tpu.dot_dimension_numbers<[1], [0], [0], [1], [0, 0, 1, 1], [], []>} : vector<8x128xf32>, vector<128x128xf32>, vector<8x128xf32> -> vector<8x128xf32>
    %c0_9 = arith.constant 0 : index
    %c0_10 = arith.constant 0 : index
    %10 = vector.load %arg5[%c0_9, %c0_10] : memref<1x128xf32, #tpu.memory_space<vmem>>, vector<1x128xf32>
    %11 = vector.broadcast %10 : vector<1x128xf32> to vector<8x128xf32>
    %12 = arith.addf %9, %11 : vector<8x128xf32>
    %cst_11 = arith.constant 0.000000e+00 : f32
    %13 = vector.broadcast %cst_11 : f32 to vector<8x128xf32>
    %14 = arith.maximumf %12, %13 : vector<8x128xf32>
    %c0_12 = arith.constant 0 : index
    %c0_13 = arith.constant 0 : index
    %15 = vector.load %arg6[%c0_12, %c0_13] : memref<128x4xf32, #tpu.memory_space<vmem>>, vector<128x4xf32>
    %cst_14 = arith.constant dense<0.000000e+00> : vector<8x4xf32>
    %16 = tpu.matmul %14, %15, %cst_14 {dimension_numbers = #tpu.dot_dimension_numbers<[1], [0], [0], [1], [0, 0, 1, 1], [], []>} : vector<8x128xf32>, vector<128x4xf32>, vector<8x4xf32> -> vector<8x4xf32>
    %c0_15 = arith.constant 0 : index
    %c0_16 = arith.constant 0 : index
    %17 = vector.load %arg7[%c0_15, %c0_16] : memref<1x4xf32, #tpu.memory_space<vmem>>, vector<1x4xf32>
    %18 = vector.broadcast %17 : vector<1x4xf32> to vector<8x4xf32>
    %19 = arith.addf %16, %18 : vector<8x4xf32>
    %c0_17 = arith.constant 0 : index
    %c0_18 = arith.constant 0 : index
    %20 = vector.load %arg8[%c0_17, %c0_18] : memref<8x4xf32, #tpu.memory_space<vmem>>, vector<8x4xf32>
    tpu.vector_store %arg8[%c0_17, %c0_18], %19 {strides = array<i32>} : memref<8x4xf32, #tpu.memory_space<vmem>>, vector<8x4xf32>,
    return
  }
  func.func @transform_0(%arg0: i32) -> (i32, i32) {
    %c0_i32 = arith.constant 0 : i32
    %c0_i32_0 = arith.constant 0 : i32
    return %arg0, %c0_i32 : i32, i32
  }
  func.func @transform_1(%arg0: i32) -> (i32, i32) {
    %c0_i32 = arith.constant 0 : i32
    %c0_i32_0 = arith.constant 0 : i32
    %c0_i32_1 = arith.constant 0 : i32
    return %c0_i32, %c0_i32_0 : i32, i32
  }
  func.func @transform_2(%arg0: i32) -> (i32, i32) {
    %c0_i32 = arith.constant 0 : i32
    %c0_i32_0 = arith.constant 0 : i32
    %c0_i32_1 = arith.constant 0 : i32
    return %c0_i32, %c0_i32_0 : i32, i32
  }
  func.func @transform_3(%arg0: i32) -> (i32, i32) {
    %c0_i32 = arith.constant 0 : i32
    %c0_i32_0 = arith.constant 0 : i32
    %c0_i32_1 = arith.constant 0 : i32
    return %c0_i32, %c0_i32_0 : i32, i32
  }
  func.func @transform_4(%arg0: i32) -> (i32, i32) {
    %c0_i32 = arith.constant 0 : i32
    %c0_i32_0 = arith.constant 0 : i32
    %c0_i32_1 = arith.constant 0 : i32
    return %c0_i32, %c0_i32_0 : i32, i32
  }
  func.func @transform_5(%arg0: i32) -> (i32, i32) {
    %c0_i32 = arith.constant 0 : i32
    %c0_i32_0 = arith.constant 0 : i32
    %c0_i32_1 = arith.constant 0 : i32
    return %c0_i32, %c0_i32_0 : i32, i32
  }
  func.func @transform_6(%arg0: i32) -> (i32, i32) {
    %c0_i32 = arith.constant 0 : i32
    %c0_i32_0 = arith.constant 0 : i32
    %c0_i32_1 = arith.constant 0 : i32
    return %c0_i32, %c0_i32_0 : i32, i32
  }
  func.func @transform_7(%arg0: i32) -> (i32, i32) {
    %c0_i32 = arith.constant 0 : i32
    %c0_i32_0 = arith.constant 0 : i32
    return %arg0, %c0_i32 : i32, i32
  }
}

</mosaic_0001>

<bundles_post_ra>
// kernel: qnetwork_forward.1
= control target key start
LH: loop header
LB: loop body
LE: loop exit
PB: predicated region body
PF: predicated region fallthrough
CT: control target
= control target key end

     0   :  { %12 = vsyncpa [#allocation3], 0  ;;  %s395_s0 = inlined_call_operand.hbm [shape: f32[8,16], index: 0, kind: input, shape index: {}]   ;;  %s396_s1 = inlined_call_operand.hbm [shape: f32[16,128], index: 1, kind: input, shape index: {}]   ;;  %s397_s2 = inlined_call_operand.vmem [shape: f32[1,128], index: 2, kind: input, shape index: {}]   ;;  %s398_s3 = inlined_call_operand.vmem [shape: f32[128,128], index: 3, kind: input, shape index: {}]   ;;  %s399_s4 = inlined_call_operand.vmem [shape: f32[1,128], index: 4, kind: input, shape index: {}]   ;;  %s400_s5 = inlined_call_operand.vmem [shape: f32[128,4], index: 5, kind: input, shape index: {}]   ;;  %s401_s6 = inlined_call_operand.vmem [shape: f32[1,4], index: 6, kind: input, shape index: {}]   ;;  %s402_s7 = inlined_call_operand.vmem [shape: f32[8,4], index: 7, kind: output, shape index: {}]  }
   0x1   :  { %s19_s26 = sshll.u32 %s395_s0, 4  ;;  %s20_s26 = int_to_ptr.hbm [resolvable:$true] %s19_s26 }
   0x2   :  { %13 = vsyncpa [#allocation5], 0  ;;  %s237_s27 = smov [#allocation2]   ;;  %s29_s8 = sshll.u32 %s396_s1, 4  ;;  %s30_s8 = int_to_ptr.hbm [resolvable:$true] %s29_s8 }
   0x3   :  { %s21_s28 = sshll.u32 %s237_s27, 4  ;;  %s238_s9 = smov [#allocation4]   ;;  %s22_s28 = int_to_ptr.vmem [resolvable:$true] %s21_s28 }
   0x4   :  { %24 = dma.hbm_to_vmem [thread:$0]  %s20_s26, 128, %s22_s28, [#allocation3]  }
   0x5   :  { %s31_s10 = sshll.u32 %s238_s9, 4  ;;  %s239_s11 = smov 128   ;;  %s32_s10 = int_to_ptr.vmem [resolvable:$true] %s31_s10 }
   0x6   :  { %s240_s12 = smov 8  }
   0x7   :  { %37 = dma.hbm_to_vmem [thread:$0]  %s30_s8, 256, %s32_s10, [#allocation5], %s239_s11, %s239_s11, %s240_s12  }
   0x8   :  { %233 = dma.done.wait [#allocation3], 128  }
   0x9   :  { %234 = vsyncadd [#allocation3], 4294967168 }
   0xa   :  { %235 = dma.done.wait [#allocation5], 256  }
   0xb   :  { %236 = vsyncadd [#allocation5], 4294967040  ;;  %v58_v0 = vld [vmem:[#allocation4 + $0x8] sm:$0xff]  ;;  %v57_v1 = vld [vmem:[#allocation4] sm:$0xff]  ;;  %vm63_vm0 = vcmask 130048   ;;  %vm169_vm1 = vcmask 31744  }
   0xc   :  { %81 = vmatpush.msra.mxu0 %v58_v0  ;;  %v56_v2 = vld [vmem:[#allocation2] sm:$0xff]  ;;  %v103_v3 = vld [vmem:[%s398_s3 + $0x78] sm:$0xff]  ;;  %v102_v4 = vld [vmem:[%s398_s3 + $0x70] sm:$0xff] }
   0xd   :  { %108 = vmatpush.msra.mxu1 %v103_v3  ;;  %v101_v5 = vld [vmem:[%s398_s3 + $0x68] sm:$0xff]  ;;  %v100_v6 = vld [vmem:[%s398_s3 + $0x60] sm:$0xff]  ;;  %v99_v7 = vld [vmem:[%s398_s3 + $0x58] sm:$0xff] }
   0xe   :  { %82 = vmatpush.msra.mxu0 %v57_v1  ;;  %v98_v8 = vld [vmem:[%s398_s3 + $0x50] sm:$0xff]  ;;  %v97_v9 = vld [vmem:[%s398_s3 + $0x48] sm:$0xff]  ;;  %v96_v10 = vld [vmem:[%s398_s3 + $0x40] sm:$0xff] }
   0xf   :  { %177 = vmatmul.msk.f32.vlgmr.msra.gmra.mxu0 %vm63_vm0, %v56_v2  ;;  %109 = vmatpush.msra.mxu1 %v102_v4  ;;  %v95_v11 = vld [vmem:[%s398_s3 + $0x38] sm:$0xff]  ;;  %v94_v12 = vld [vmem:[%s398_s3 + $0x30] sm:$0xff]  ;;  %v93_v13 = vld [vmem:[%s398_s3 + $0x28] sm:$0xff] }
  0x10   :  { %v92_v14 = vld [vmem:[%s398_s3 + $0x20] sm:$0xff]  ;;  %v91_v15 = vld [vmem:[%s398_s3 + $0x18] sm:$0xff]  ;;  %v90_v16 = vld [vmem:[%s398_s3 + $0x10] sm:$0xff] }
  0x11   :  { %110 = vmatpush.msra.mxu1 %v101_v5  ;;  %v89_v17 = vld [vmem:[%s398_s3 + $0x8] sm:$0xff]  ;;  %v88_v18 = vld [vmem:[%s398_s3] sm:$0xff]  ;;  %v144_v19 = vld [vmem:[%s400_s5 + $0x78] sm:$0xff] }
  0x12   :  { %v143_v20 = vld [vmem:[%s400_s5 + $0x70] sm:$0xff]  ;;  %149 = vmatpush.msra.mxu2 %v144_v19  ;;  %v142_v21 = vld [vmem:[%s400_s5 + $0x68] sm:$0xff]  ;;  %v141_v22 = vld [vmem:[%s400_s5 + $0x60] sm:$0xff] }
  0x13   :  { %111 = vmatpush.msra.mxu1 %v100_v6  ;;  %v140_v23 = vld [vmem:[%s400_s5 + $0x58] sm:$0xff]  ;;  %v139_v24 = vld [vmem:[%s400_s5 + $0x50] sm:$0xff]  ;;  %v138_v25 = vld [vmem:[%s400_s5 + $0x48] sm:$0xff] }
  0x14   :  { %150 = vmatpush.msra.mxu2 %v143_v20  ;;  %v137_v26 = vld [vmem:[%s400_s5 + $0x40] sm:$0xff]  ;;  %v136_v27 = vld [vmem:[%s400_s5 + $0x38] sm:$0xff]  ;;  %v135_v28 = vld [vmem:[%s400_s5 + $0x30] sm:$0xff] }
  0x15   :  { %112 = vmatpush.msra.mxu1 %v99_v7  ;;  %v134_v29 = vld [vmem:[%s400_s5 + $0x28] sm:$0xff]  ;;  %v133_v30 = vld [vmem:[%s400_s5 + $0x20] sm:$0xff]  ;;  %v132_v31 = vld [vmem:[%s400_s5 + $0x18] sm:$0xff] }
  0x16   :  { %151 = vmatpush.msra.mxu2 %v142_v21  ;;  %v182_v32 = vld [vmem:[%s397_s2] ss:$0 sm:$0xff]  ;;  %v131_v36 = vld [vmem:[%s400_s5 + $0x10] sm:$0xff]  ;;  %v130_v37 = vld [vmem:[%s400_s5 + $0x8] sm:$0xff] }
  0x17   :  { %113 = vmatpush.msra.mxu1 %v98_v8  ;;  %v129_v38 = vld [vmem:[%s400_s5] sm:$0xff] }
  0x18   :  { %152 = vmatpush.msra.mxu2 %v141_v22  ;;  %v183_v39 = vld [vmem:[%s399_s4] ss:$0 sm:$0xff] }
  0x19   :  { %114 = vmatpush.msra.mxu1 %v97_v9  ;;  %v184_v43 = vld [vmem:[%s401_s6] ss:$0 sm:$0xff] }
  0x1a   :  { %153 = vmatpush.msra.mxu2 %v140_v23 }
  0x1b   :  { %115 = vmatpush.msra.mxu1 %v96_v10 }
  0x1c   :  { %154 = vmatpush.msra.mxu2 %v139_v24 }
  0x1d   :  { %116 = vmatpush.msra.mxu1 %v95_v11 }
  0x1e   :  { %155 = vmatpush.msra.mxu2 %v138_v25 }
  0x1f   :  { %117 = vmatpush.msra.mxu1 %v94_v12 }
  0x20   :  { %156 = vmatpush.msra.mxu2 %v137_v26 }
  0x21   :  { %118 = vmatpush.msra.mxu1 %v93_v13 }
  0x22   :  { %157 = vmatpush.msra.mxu2 %v136_v27 }
  0x23   :  { %119 = vmatpush.msra.mxu1 %v92_v14 }
  0x24   :  { %158 = vmatpush.msra.mxu2 %v135_v28 }
  0x25   :  { %120 = vmatpush.msra.mxu1 %v91_v15 }
  0x26   :  { %159 = vmatpush.msra.mxu2 %v134_v29 }
  0x27   :  { %121 = vmatpush.msra.mxu1 %v90_v16 }
  0x28   :  { %160 = vmatpush.msra.mxu2 %v133_v30 }
  0x29   :  { %122 = vmatpush.msra.mxu1 %v89_v17 }
  0x2a   :  { %161 = vmatpush.msra.mxu2 %v132_v31 }
  0x2b   :  { %123 = vmatpush.msra.mxu1 %v88_v18 }
  0x2c   :  { %162 = vmatpush.msra.mxu2 %v131_v36 }
  0x2e   :  { %163 = vmatpush.msra.mxu2 %v130_v37 }
  0x30   :  { %164 = vmatpush.msra.mxu2 %v129_v38 }
  0x8c   :  { %v84_v33 = vpop.f32.mrf.mxu0 }
  0x8d   :  { %v85_v34 = vadd.f32 %v182_v32, %v84_v33 }
  0x8f   :  { %v87_v35 = vmax.f32 %v85_v34, 0.0 }
  0x91   :  { %124 = vmatmul.f32.vlgmr.msra.gmra.mxu1 %v87_v35 }
 0x10e   :  { %v125_v40 = vpop.f32.mrf.mxu1 }
 0x10f   :  { %v126_v41 = vadd.f32 %v183_v39, %v125_v40 }
 0x111   :  { %v128_v42 = vmax.f32 %v126_v41, 0.0 }
 0x113   :  { %165 = vmatmul.f32.vlgmr.msra.gmra.mxu2 %v128_v42 }
 0x196   :  { %v166_v44 = vpop.f32.mrf.mxu2 }
 0x197   :  { %v167_v45 = vadd.f32 %v184_v43, %v166_v44 }
 0x199   :  { %170 = vst.msk [vmem:[%s402_s7] sm:$0xff] %vm169_vm1, %v167_v45 }
 0x19a   :  { %175 = vsyncpa [#allocation3], 1 }
 0x19b   :  { %176 = vsyncpa [#allocation5], 1 }

</bundles_post_ra>
